<compile_context>
chip_gen: v7x
topology: tpu7x:2x2x1
jax: 0.10.0
libtpu: 0.0.40
codegen_flags: <defaults>
</compile_context>

<pallas_src>
import jax
import jax.numpy as jnp
from jax.experimental import pallas as pl
from jax.experimental.pallas import tpu as pltpu


def _round_up(a: int, b: int) -> int:
    return (a + b - 1) // b * b


# ----------------------------- kernels --------------------------------------

def _matmul_kernel_single(x_ref, w_ref, o_ref):
    # Whole problem in one VMEM block: one MXU matmul, f32 accumulation.
    o_ref[...] = jnp.dot(x_ref[...], w_ref[...],
                         preferred_element_type=jnp.float32).astype(o_ref.dtype)


def _matmul_kernel_grid(x_ref, w_ref, o_ref):
    # grid = (M/tm, N/tn, K/tk); k (reduction) is the last, "arbitrary" axis.
    # The f32 output block is resident across k, so accumulate into it directly.
    @pl.when(pl.program_id(2) == 0)
    def _init():
        o_ref[...] = jnp.zeros_like(o_ref)

    o_ref[...] += jnp.dot(x_ref[...], w_ref[...],
                          preferred_element_type=jnp.float32)


# ----------------------------- wrapper ---------------------------------------

_FAST_PATH_MAX_BYTES = 8 * 1024 * 1024  # full-array VMEM footprint budget


def linear_regressor_forward(x, ts, weight_M, *, use_bf16=False):
    """Mirrors Linear_Regressor.forward: torch.matmul(x, weight_M); ts unused."""
    del ts  # the reference forward ignores ts

    dh, do = weight_M.shape
    lead_shape = x.shape[:-1]
    in_dtype = jnp.bfloat16 if use_bf16 else jnp.float32
    itemsize = 2 if use_bf16 else 4

    x2 = x.reshape(-1, dh).astype(in_dtype)
    w = weight_M.astype(in_dtype)
    M, K, N = x2.shape[0], dh, do

    # ---- small-shape fast path: single un-gridded call, full-array blocks ----
    total_bytes = itemsize * (M * K + K * N) + 4 * M * N
    if M <= 512 and K <= 1024 and N <= 512 and total_bytes <= _FAST_PATH_MAX_BYTES:
        y = pl.pallas_call(
            _matmul_kernel_single,
            out_shape=jax.ShapeDtypeStruct((M, N), jnp.float32),
        )(x2, w)
        return y.reshape(*lead_shape, N)

    # ---- tiled path: large lane-dense tiles, K-only zero padding -------------
    tm = min(512, _round_up(M, 8))
    tn = min(512, _round_up(N, 128))
    Kp = _round_up(K, 128)
    # Largest 128-multiple tile (<= 512) that divides the padded K, so every
    # k block is fully zero-padded real data (no garbage in the reduction).
    tk = next(c for c in (512, 384, 256, 128) if Kp % c == 0)

    if Kp != K:
        x2 = jnp.pad(x2, ((0, 0), (0, Kp - K)))
        w = jnp.pad(w, ((0, Kp - K), (0, 0)))

    grid = (pl.cdiv(M, tm), pl.cdiv(N, tn), Kp // tk)

    cost = pl.CostEstimate(
        flops=2 * M * Kp * N,
        transcendentals=0,
        # x is re-streamed once per N block, w once per M block, plus the output.
        bytes_accessed=itemsize * (M * Kp * grid[1] + Kp * N * grid[0]) + 4 * M * N,
    )

    # Double-buffered input tiles + output accumulator tile (+ headroom); cap at
    # 48 MiB so the same choice is safe on v7x's 64 MiB/TC VMEM.
    vmem_bytes = itemsize * 2 * (tm * tk + tk * tn) + 4 * 2 * tm * tn
    vmem_limit = int(min(48 * 1024 * 1024, max(32 * 1024 * 1024, 2 * vmem_bytes)))

    y = pl.pallas_call(
        _matmul_kernel_grid,
        out_shape=jax.ShapeDtypeStruct((M, N), jnp.float32),
        grid_spec=pltpu.PrefetchScalarGridSpec(
            num_scalar_prefetch=0,
            grid=grid,
            in_specs=[
                pl.BlockSpec((tm, tk), lambda i, j, k: (i, k)),
                pl.BlockSpec((tk, tn), lambda i, j, k: (k, j)),
            ],
            out_specs=pl.BlockSpec((tm, tn), lambda i, j, k: (i, j)),
        ),
        compiler_params=pltpu.CompilerParams(
            dimension_semantics=("parallel", "parallel", "arbitrary"),
            vmem_limit_bytes=vmem_limit,
        ),
        cost_estimate=cost,
    )(x2, w)

    return y.reshape(*lead_shape, N)


def init_weight(key, dh, do):
    # torch.nn.init.xavier_uniform_: U(-a, a) with a = sqrt(6 / (fan_in + fan_out))
    bound = jnp.sqrt(6.0 / (dh + do))
    return jax.random.uniform(key, (dh, do), jnp.float32, -bound, bound)


if __name__ == "__main__":
    key = jax.random.PRNGKey(0)
    k_w, k_x, k_w2, k_x2 = jax.random.split(key, 4)

    # Small shapes consistent with the module: batch=2, seq=8, hidden=32 -> out=16
    batch, seq, dh, do = 2, 8, 32, 16
    weight_M = init_weight(k_w, dh, do)
    x = jax.random.normal(k_x, (batch, seq, dh), jnp.float32)
    ts = jnp.arange(seq, dtype=jnp.float32)  # accepted but unused, as in the spec

    out = jax.block_until_ready(linear_regressor_forward(x, ts, weight_M))
    ref = jnp.matmul(x, weight_M, precision=jax.lax.Precision.HIGHEST)
    assert out.shape == (batch, seq, do), out.shape
    assert bool(jnp.all(jnp.isfinite(out)))
    assert jnp.allclose(out, ref, atol=1e-5, rtol=1e-5), float(
        jnp.max(jnp.abs(out - ref)))

    # Exercise the tiled (gridded) path once as well: multi-k accumulation and a
    # partial M block, still modest sizes.
    b2, s2, dh2, do2 = 2, 384, 1024, 256
    weight_M2 = init_weight(k_w2, dh2, do2)
    x_big = jax.random.normal(k_x2, (b2, s2, dh2), jnp.float32)
    out2 = jax.block_until_ready(linear_regressor_forward(x_big, ts, weight_M2))
    ref2 = jnp.matmul(x_big, weight_M2, precision=jax.lax.Precision.HIGHEST)
    assert out2.shape == (b2, s2, do2), out2.shape
    assert bool(jnp.all(jnp.isfinite(out2)))
    assert jnp.allclose(out2, ref2, atol=1e-4, rtol=1e-4), float(
        jnp.max(jnp.abs(out2 - ref2)))

    print("KERNEL_OK")
</pallas_src>

<mosaic_0001>
module attributes {stable_mosaic.version = 11 : i64} {
  func.func @_matmul_kernel_single(%arg0: memref<16x32xf32, #tpu.memory_space<vmem>>, %arg1: memref<32x16xf32, #tpu.memory_space<vmem>>, %arg2: memref<16x16xf32, #tpu.memory_space<vmem>>) attributes {dimension_semantics = [], scalar_prefetch = 0 : i64, scratch_operands = 0 : i64, tpu.core_type = #tpu.core_type<tc>} {
    %c0 = arith.constant 0 : index
    %c0_0 = arith.constant 0 : index
    %0 = vector.load %arg0[%c0, %c0_0] : memref<16x32xf32, #tpu.memory_space<vmem>>, vector<16x32xf32>
    %c0_1 = arith.constant 0 : index
    %c0_2 = arith.constant 0 : index
    %1 = vector.load %arg1[%c0_1, %c0_2] : memref<32x16xf32, #tpu.memory_space<vmem>>, vector<32x16xf32>
    %cst = arith.constant dense<0.000000e+00> : vector<16x16xf32>
    %2 = tpu.matmul %0, %1, %cst {dimension_numbers = #tpu.dot_dimension_numbers<[1], [0], [0], [1], [0, 0, 1, 1], [], []>} : vector<16x32xf32>, vector<32x16xf32>, vector<16x16xf32> -> vector<16x16xf32>
    %c0_3 = arith.constant 0 : index
    %c0_4 = arith.constant 0 : index
    %3 = vector.load %arg2[%c0_3, %c0_4] : memref<16x16xf32, #tpu.memory_space<vmem>>, vector<16x16xf32>
    tpu.vector_store %arg2[%c0_3, %c0_4], %2 {strides = array<i32>} : memref<16x16xf32, #tpu.memory_space<vmem>>, vector<16x16xf32>,
    return
  }
}

</mosaic_0001>

<bundles_post_ra>
// kernel: tpu_custom_call.1
= control target key start
LH: loop header
LB: loop body
LE: loop exit
PB: predicated region body
PF: predicated region fallthrough
CT: control target
= control target key end

     0   :  { %vm18_vm0 = vcmask 261120   ;;  %s221_s0 = inlined_call_operand.vmem [shape: f32[16,32], index: 0, kind: input, shape index: {}]   ;;  %s222_s1 = inlined_call_operand.vmem [shape: f32[32,16], index: 1, kind: input, shape index: {}]   ;;  %s223_s2 = inlined_call_operand.hbm [shape: f32[16,16], index: 2, kind: output, shape index: {}]  }
   0x1   :  { %v14_v0 = vld [vmem:[%s222_s1] sm:$0xff]  ;;  %v15_v1 = vld [vmem:[%s222_s1 + $0x8] sm:$0xff]  ;;  %v16_v2 = vld [vmem:[%s222_s1 + $0x10] sm:$0xff] }
   0x2   :  { %v138_v3 = vpack.c.bf16 %v15_v1, %v14_v0  ;;  %v17_v4 = vld [vmem:[%s222_s1 + $0x18] sm:$0xff]  ;;  %v12_v5 = vld [vmem:[%s221_s0] sm:$0xff] }
   0x3   :  { %v142_v6 = vpack.c.bf16 %v17_v4, %v16_v2  ;;  %135 = vmatprep.mubr.msk.f32.mxu0 %vm18_vm0, %v12_v5 }
   0x4   :  { %7 = vsyncpa [#allocation3], 0  ;;  %139 = vmatprep.subr.bf16.mxu0 %v138_v3  ;;  %v13_v7 = vld [vmem:[%s221_s0 + $0x8] sm:$0xff]  ;;  %s173_s21 = smov [#allocation2]   ;;  %vm100_vm1 = vcmask 130048  }
   0x5   :  { %141 = vmatpush3.bf16.msra.mxu0 %v138_v3  ;;  %s108_s22 = sshll.u32 %s173_s21, 4  ;;  %s109_s22 = int_to_ptr.vmem [resolvable:$true] %s108_s22 }
   0x6   :  { %143 = vmatprep.subr.bf16.mxu0 %v142_v6  ;;  %s149_s1 = scalar_lea.vmem %s109_s22, 256  ;;  %p154_p1 = scmp.lt.s32.totalorder %s109_s22, %s109_s22 }
   0x7   :  { %p150_p0 = scmp.ne.s32.totalorder %s109_s22, %s149_s1  ;;  %p155_p2 = scmp.lt.s32.totalorder %s149_s1, %s149_s1 }
   0x9   :  { %145 = vmatpush3.bf16.msra.mxu0 %v142_v6  ;;  %p156_p3 = por %p155_p2, %p154_p1 }
   0xb   :  { %p157_p4 = pnand %p156_p3, %p150_p0 }
   0xc   :  { %136 = vmatmul.mubr.msk.f32.vlgmr.msra.gmra.mrb[0].mxu0 %vm18_vm0, %v13_v7 }
  0xdf   :  { %v137_v8 = vpop.f32.mrb[0].mxu0 }
  0xe0   :  { %102 = vst.msk [vmem:[#allocation2 + $0x8] sm:$0xff] %vm100_vm1, %v137_v8  ;;  %v91_v9 = vpop.f32.mrb[1].mxu0 }
  0xe1   :  { %101 = vst.msk [vmem:[#allocation2] sm:$0xff] %vm100_vm1, %v91_v9 }
  0xe2   :  { %160 = shalt.err (!%p157_p4)
}
  0xe3   :  { %s161_s0 = scalar_lea.hbm %s223_s2, 256 }
  0xe4   :  { %p162_p5 = scmp.ne.s32.totalorder %s223_s2, %s161_s0  ;;  %p165_p6 = scmp.lt.u32.totalorder %s161_s0, %s223_s2 }
  0xe6   :  { %p167_p7 = pnand %p165_p6, %p162_p5 }
  0xe8   :  { %170 = shalt.err (!%p167_p7)
}
  0xe9   :  { %s174_s29 = smov 128   ;;  %s175_s30 = smov 8  }
  0xea   :  { %114 = dma.vmem_to_hbm [thread:$0]  %s109_s22, 256, %s223_s2, [#allocation3], %s174_s29, %s174_s29, %s175_s30  }
  0xeb   :  { %171 = dma.done.wait [#allocation3], 256  }
  0xec   :  { %172 = vsyncadd [#allocation3], 4294967040 }
  0xed   :  { %118 = vsyncpa [#allocation3], 1 }

</bundles_post_ra>
